<compile_context>
chip_gen: v7x
topology: tpu7x:2x2x1
jax: 0.10.0
libtpu: 0.0.40
codegen_flags: <defaults>
</compile_context>

<pallas_src>
import functools

import jax
import jax.numpy as jnp
from jax.experimental import pallas as pl
from jax.experimental.pallas import tpu as pltpu


def _round_up(v, m):
    return ((v + m - 1) // m) * m


def _predict_and_l1_kernel(x_ref, spec_ref, w_in_ref, b_in_ref,
                           w12_ref, b12_ref, o1_ref, o2_ref,
                           *, d_spec, tile, t_real, n_inner, needs_mask):
    """Per (split, time-tile): predictor matmuls + masked |out - spec| sums.

    All operands are [C, T] (time on lanes).  o1_ref / o2_ref are
    (1, D_spec, tile) f32 VMEM output blocks that stay resident across the
    inner ("arbitrary") time axis and act as elementwise partial-sum
    accumulators; each parallel split owns its own block.
    """
    c = pl.program_id(0)          # parallel split (megacore shard on v7x)
    j = pl.program_id(1)          # time-tile reduction axis

    @pl.when(j == 0)
    def _init():
        o1_ref[...] = jnp.zeros_like(o1_ref)
        o2_ref[...] = jnp.zeros_like(o2_ref)

    x = x_ref[...]                                        # (D_in, tile) bf16
    s = spec_ref[...].astype(jnp.float32)                 # (D_spec, tile) f32

    h = jnp.maximum(
        jnp.dot(w_in_ref[...], x, preferred_element_type=jnp.float32)
        + b_in_ref[...],
        0.0,
    )                                                     # (H, tile) f32

    # Fused two-head output projection: one MXU matmul serves both heads.
    out12 = (jnp.dot(w12_ref[...], h.astype(jnp.bfloat16),
                     preferred_element_type=jnp.float32)
             + b12_ref[...])                              # (2*D_spec, tile)
    out1 = out12[:d_spec, :]
    out2 = out1 + out12[d_spec:, :]                       # postnet residual

    d1 = jnp.abs(out1 - s)                                # (D_spec, tile)
    d2 = jnp.abs(out2 - s)

    if needs_mask:
        col = ((c * n_inner + j) * tile
               + jax.lax.broadcasted_iota(jnp.int32, (1, tile), 1))
        m = (col < t_real).astype(jnp.float32)            # (1, tile)
        d1 = d1 * m
        d2 = d2 * m

    # Elementwise, lane-dense accumulation; cross-lane reduce + 1/(T*D) mean
    # happen once, in the wrapper.
    o1_ref[...] += d1[None, :, :]
    o2_ref[...] += d2[None, :, :]


def predictor_l1_losses(x_t, spec_t, w_in_t, b_in, w12_t, b12, *,
                        tile_t=2048, n_split=2):
    """Fused predictor + L1-loss Pallas kernel (time-on-lanes layout).

    x_t:    (D_in,  T)       concatenated predictor inputs (any float dtype)
    spec_t: (D_spec, T)      concatenated targets
    w_in_t: (H, D_in) bf16,  b_in: (H, 1) f32
    w12_t:  (2*D_spec, H) bf16 (= [w1.T ; w2.T]),  b12: (2*D_spec, 1) f32
    Returns (loss1, loss2) scalars (mean absolute error of each head).
    """
    d_in, T = x_t.shape
    d_spec = spec_t.shape[0]
    hidden = w_in_t.shape[0]
    assert w12_t.shape == (2 * d_spec, hidden)

    # Tile sizing: as big as requested (grid-step overhead ~0.35us) but
    # clamped to the problem size and a multiple of 128 lanes.
    per_split = -(-T // n_split)
    tile = max(128, min(_round_up(tile_t, 128), _round_up(per_split, 128)))
    n_inner = max(1, -(-T // (n_split * tile)))
    t_pad = n_split * n_inner * tile
    needs_mask = (t_pad != T)

    if needs_mask:
        pad = t_pad - T
        x_t = jnp.pad(x_t, ((0, 0), (0, pad)))
        spec_t = jnp.pad(spec_t, ((0, 0), (0, pad)))

    # bf16 on the HBM side halves DMA traffic (the kernel is memory-bound);
    # all accumulation stays f32 inside the kernel.
    x_t = x_t.astype(jnp.bfloat16)
    spec_t = spec_t.astype(jnp.bfloat16)

    kernel = functools.partial(
        _predict_and_l1_kernel, d_spec=d_spec, tile=tile, t_real=T,
        n_inner=n_inner, needs_mask=needs_mask)

    o1_sums, o2_sums = pl.pallas_call(
        kernel,
        out_shape=(jax.ShapeDtypeStruct((n_split, d_spec, tile), jnp.float32),
                   jax.ShapeDtypeStruct((n_split, d_spec, tile), jnp.float32)),
        grid_spec=pltpu.PrefetchScalarGridSpec(
            num_scalar_prefetch=0,
            grid=(n_split, n_inner),
            in_specs=[
                pl.BlockSpec((d_in, tile), lambda c, j: (0, c * n_inner + j)),
                pl.BlockSpec((d_spec, tile), lambda c, j: (0, c * n_inner + j)),
                pl.BlockSpec((hidden, d_in), lambda c, j: (0, 0)),        # w_in^T
                pl.BlockSpec((hidden, 1), lambda c, j: (0, 0)),           # b_in
                pl.BlockSpec((2 * d_spec, hidden), lambda c, j: (0, 0)),  # w12^T
                pl.BlockSpec((2 * d_spec, 1), lambda c, j: (0, 0)),       # b12
            ],
            out_specs=(pl.BlockSpec((1, d_spec, tile), lambda c, j: (c, 0, 0)),
                       pl.BlockSpec((1, d_spec, tile), lambda c, j: (c, 0, 0))),
        ),
        compiler_params=pltpu.CompilerParams(
            dimension_semantics=("parallel", "arbitrary")),
    )(x_t, spec_t, w_in_t, b_in, w12_t, b12)

    inv_n = 1.0 / float(T * d_spec)
    loss1 = jnp.sum(o1_sums) * inv_n
    loss2 = jnp.sum(o2_sums) * inv_n
    return loss1, loss2


def _assemble_x_t(f0, phoneme, spk_emb):
    """Per-utterance feature concat, then time concat (mirrors the torch cat),
    assembled directly in the lane-dense [C, T] layout."""
    cols = []
    for b in range(len(f0)):
        feats = [f0[b].astype(jnp.float32).T, phoneme[b].astype(jnp.float32).T]
        if spk_emb is not None:
            L = f0[b].shape[0]
            feats.append(jnp.broadcast_to(spk_emb[b][:, None],
                                          (spk_emb.shape[1], L)))
        cols.append(jnp.concatenate(feats, axis=0))
    return jnp.concatenate(cols, axis=1)


class PallasModel:
    """Mirror of the torch `Model` wrapper (loss module around a predictor)."""

    def __init__(self, params, tile_t=2048, n_split=2):
        self.params = params
        self.tile_t = tile_t
        self.n_split = n_split
        self.training = False
        # Predictor weights prepared once: bf16 MXU operands, transposed for
        # the [C, T] layout, fused output heads.
        self._w_in_t = params["w_in"].T.astype(jnp.bfloat16)       # (H, D_in)
        self._b_in = params["b_in"].T.astype(jnp.float32)          # (H, 1)
        self._w12_t = jnp.concatenate([params["w1"], params["w2"]],
                                      axis=1).T.astype(jnp.bfloat16)  # (2D, H)
        self._b12 = jnp.concatenate([params["b1"], params["b2"]],
                                    axis=1).T.astype(jnp.float32)   # (2D, 1)

    def forward(self, f0, phoneme, spec, speaker_id=None):
        batch_size = len(spec)

        # --- predictor input assembly (glue, plain JAX) ---
        if speaker_id is not None:
            sid = jnp.stack(speaker_id)                         # torch.stack
            spk_emb = self.params["speaker_emb"][sid]           # (B, E)
        else:
            spk_emb = None

        x_t = _assemble_x_t(f0, phoneme, spk_emb)               # (D_in, T)
        spec_t = jnp.concatenate(spec, axis=0).T                # (D_spec, T)

        # --- hot path: predictor matmuls + L1 reductions in Pallas ---
        loss1, loss2 = predictor_l1_losses(
            x_t, spec_t, self._w_in_t, self._b_in, self._w12_t, self._b12,
            tile_t=self.tile_t, n_split=self.n_split)
        loss = loss1 + loss2

        losses = dict(loss=loss, loss1=loss1, loss2=loss2)
        if not self.training:
            losses = {k: (l, batch_size) for k, l in losses.items()}
        self.last_losses = losses  # TODO(synk): stands in for report(losses, self)
        return loss


def _reference_losses(x, spec, params):
    """Pure-JAX mirror of the kernel's bf16-operand / f32-accumulate math
    (written in the natural [T, C] orientation)."""
    bf = jnp.bfloat16
    xb = x.astype(bf)
    sb = spec.astype(bf).astype(jnp.float32)
    h = jnp.maximum(
        jnp.dot(xb, params["w_in"].astype(bf),
                preferred_element_type=jnp.float32) + params["b_in"], 0.0)
    h16 = h.astype(bf)
    o1 = jnp.dot(h16, params["w1"].astype(bf),
                 preferred_element_type=jnp.float32) + params["b1"]
    o2 = o1 + jnp.dot(h16, params["w2"].astype(bf),
                      preferred_element_type=jnp.float32) + params["b2"]
    return jnp.mean(jnp.abs(o1 - sb)), jnp.mean(jnp.abs(o2 - sb))


if __name__ == "__main__":
    key = jax.random.PRNGKey(0)
    keys = jax.random.split(key, 16)

    # problem sizes (small demo shapes)
    phoneme_size = 7
    speaker_emb_dim = 4
    num_speakers = 3
    hidden = 32
    spec_dim = 16
    lengths = [200, 153]        # total T = 353: exercises padding/masking
    d_in = 1 + phoneme_size + speaker_emb_dim

    # deterministic synthetic parameters
    params = {
        "speaker_emb": 0.1 * jax.random.normal(keys[0], (num_speakers, speaker_emb_dim), jnp.float32),
        "w_in": 0.2 * jax.random.normal(keys[1], (d_in, hidden), jnp.float32),
        "b_in": 0.1 * jax.random.normal(keys[2], (1, hidden), jnp.float32),
        "w1": 0.2 * jax.random.normal(keys[3], (hidden, spec_dim), jnp.float32),
        "b1": 0.1 * jax.random.normal(keys[4], (1, spec_dim), jnp.float32),
        "w2": 0.2 * jax.random.normal(keys[5], (hidden, spec_dim), jnp.float32),
        "b2": 0.1 * jax.random.normal(keys[6], (1, spec_dim), jnp.float32),
    }

    # deterministic inputs (lists of per-utterance tensors, as in the module)
    f0 = [jax.random.normal(keys[7 + i], (L, 1), jnp.float32)
          for i, L in enumerate(lengths)]
    phoneme = [jax.random.normal(keys[9 + i], (L, phoneme_size), jnp.float32)
               for i, L in enumerate(lengths)]
    spec = [jax.random.normal(keys[11 + i], (L, spec_dim), jnp.float32)
            for i, L in enumerate(lengths)]
    speaker_id = [jnp.asarray(i % num_speakers, jnp.int32)
                  for i in range(len(lengths))]

    # pure-JAX reference
    sid = jnp.stack(speaker_id)
    spk = params["speaker_emb"][sid]
    x_ref = _assemble_x_t(f0, phoneme, spk).T                  # (T, D_in)
    spec_ref = jnp.concatenate(spec, axis=0)                   # (T, D_spec)
    ref1, ref2 = _reference_losses(x_ref, spec_ref, params)
    ref = ref1 + ref2

    # run the default (large-tile, one inner step) config and a small-tile
    # config that forces multi-step accumulation over the inner time axis
    for tile_t in (2048, 128):
        model = PallasModel(params, tile_t=tile_t)
        loss = jax.block_until_ready(model.forward(f0, phoneme, spec, speaker_id))
        assert jnp.allclose(loss, ref, rtol=1e-3, atol=1e-4), (tile_t, loss, ref)

    print("KERNEL_OK")
</pallas_src>

<mosaic_0001>
module attributes {stable_mosaic.version = 11 : i64} {
  func.func @_predict_and_l1_kernel(%arg0: i32, %arg1: i32, %arg2: memref<12x256xbf16, #tpu.memory_space<vmem>>, %arg3: memref<16x256xbf16, #tpu.memory_space<vmem>>, %arg4: memref<32x12xbf16, #tpu.memory_space<vmem>>, %arg5: memref<32x1xf32, #tpu.memory_space<vmem>>, %arg6: memref<32x32xbf16, #tpu.memory_space<vmem>>, %arg7: memref<32x1xf32, #tpu.memory_space<vmem>>, %arg8: memref<1x16x256xf32, #tpu.memory_space<vmem>>, %arg9: memref<1x16x256xf32, #tpu.memory_space<vmem>>) attributes {dimension_semantics = [#tpu.dimension_semantics<parallel>, #tpu.dimension_semantics<arbitrary>], iteration_bounds = array<i64: 2, 1>, scalar_prefetch = 0 : i64, scratch_operands = 0 : i64, tpu.core_type = #tpu.core_type<tc>, window_params = [{transform_indices = @transform_0, window_bounds = array<i64: 12, 256>}, {transform_indices = @transform_1, window_bounds = array<i64: 16, 256>}, {pipeline_mode = #tpu.pipeline_mode<synchronous>, transform_indices = @transform_2, window_bounds = array<i64: 32, 12>}, {pipeline_mode = #tpu.pipeline_mode<synchronous>, transform_indices = @transform_3, window_bounds = array<i64: 32, 1>}, {pipeline_mode = #tpu.pipeline_mode<synchronous>, transform_indices = @transform_4, window_bounds = array<i64: 32, 32>}, {pipeline_mode = #tpu.pipeline_mode<synchronous>, transform_indices = @transform_5, window_bounds = array<i64: 32, 1>}, {transform_indices = @transform_6, window_bounds = array<i64: 1, 16, 256>}, {transform_indices = @transform_7, window_bounds = array<i64: 1, 16, 256>}]} {
    %c0_i32 = arith.constant 0 : i32
    %0 = arith.cmpi eq, %arg1, %c0_i32 : i32
    %1 = arith.extui %0 : i1 to i32
    %c0_i32_0 = arith.constant 0 : i32
    %2 = arith.cmpi ne, %1, %c0_i32_0 : i32
    scf.if %2 {
      %cst_26 = arith.constant 0.000000e+00 : f32
      %48 = vector.broadcast %cst_26 : f32 to vector<1x16x256xf32>
      %c0_27 = arith.constant 0 : index
      %c0_28 = arith.constant 0 : index
      %c0_29 = arith.constant 0 : index
      %49 = vector.load %arg8[%c0_27, %c0_28, %c0_29] : memref<1x16x256xf32, #tpu.memory_space<vmem>>, vector<1x16x256xf32>
      tpu.vector_store %arg8[%c0_27, %c0_28, %c0_29], %48 {strides = array<i32>} : memref<1x16x256xf32, #tpu.memory_space<vmem>>, vector<1x16x256xf32>,
      %cst_30 = arith.constant 0.000000e+00 : f32
      %50 = vector.broadcast %cst_30 : f32 to vector<1x16x256xf32>
      %c0_31 = arith.constant 0 : index
      %c0_32 = arith.constant 0 : index
      %c0_33 = arith.constant 0 : index
      %51 = vector.load %arg9[%c0_31, %c0_32, %c0_33] : memref<1x16x256xf32, #tpu.memory_space<vmem>>, vector<1x16x256xf32>
      tpu.vector_store %arg9[%c0_31, %c0_32, %c0_33], %50 {strides = array<i32>} : memref<1x16x256xf32, #tpu.memory_space<vmem>>, vector<1x16x256xf32>,
    } else {
    }
    %c0 = arith.constant 0 : index
    %c0_1 = arith.constant 0 : index
    %3 = vector.load %arg2[%c0, %c0_1] : memref<12x256xbf16, #tpu.memory_space<vmem>>, vector<12x256xbf16>
    %c0_2 = arith.constant 0 : index
    %c0_3 = arith.constant 0 : index
    %4 = vector.load %arg3[%c0_2, %c0_3] : memref<16x256xbf16, #tpu.memory_space<vmem>>, vector<16x256xbf16>
    %5 = arith.extf %4 : vector<16x256xbf16> to vector<16x256xf32>
    %c0_4 = arith.constant 0 : index
    %c0_5 = arith.constant 0 : index
    %6 = vector.load %arg4[%c0_4, %c0_5] : memref<32x12xbf16, #tpu.memory_space<vmem>>, vector<32x12xbf16>
    %cst = arith.constant dense<0.000000e+00> : vector<32x256xf32>
    %7 = tpu.matmul %6, %3, %cst {dimension_numbers = #tpu.dot_dimension_numbers<[1], [0], [0], [1], [0, 0, 1, 1], [], []>} : vector<32x12xbf16>, vector<12x256xbf16>, vector<32x256xf32> -> vector<32x256xf32>
    %c0_6 = arith.constant 0 : index
    %c0_7 = arith.constant 0 : index
    %8 = vector.load %arg5[%c0_6, %c0_7] : memref<32x1xf32, #tpu.memory_space<vmem>>, vector<32x1xf32>
    %9 = vector.broadcast %8 : vector<32x1xf32> to vector<32x256xf32>
    %10 = arith.addf %7, %9 : vector<32x256xf32>
    %cst_8 = arith.constant 0.000000e+00 : f32
    %11 = vector.broadcast %cst_8 : f32 to vector<32x256xf32>
    %12 = arith.maximumf %10, %11 : vector<32x256xf32>
    %c0_9 = arith.constant 0 : index
    %c0_10 = arith.constant 0 : index
    %13 = vector.load %arg6[%c0_9, %c0_10] : memref<32x32xbf16, #tpu.memory_space<vmem>>, vector<32x32xbf16>
    %14 = arith.truncf %12 : vector<32x256xf32> to vector<32x256xbf16>
    %cst_11 = arith.constant dense<0.000000e+00> : vector<32x256xf32>
    %15 = tpu.matmul %13, %14, %cst_11 {dimension_numbers = #tpu.dot_dimension_numbers<[1], [0], [0], [1], [0, 0, 1, 1], [], []>} : vector<32x32xbf16>, vector<32x256xbf16>, vector<32x256xf32> -> vector<32x256xf32>
    %c0_12 = arith.constant 0 : index
    %c0_13 = arith.constant 0 : index
    %16 = vector.load %arg7[%c0_12, %c0_13] : memref<32x1xf32, #tpu.memory_space<vmem>>, vector<32x1xf32>
    %17 = vector.broadcast %16 : vector<32x1xf32> to vector<32x256xf32>
    %18 = arith.addf %15, %17 : vector<32x256xf32>
    %19 = vector.extract_strided_slice %18 {offsets = [0, 0], sizes = [16, 256], strides = [1, 1]} : vector<32x256xf32> to vector<16x256xf32>
    %20 = vector.extract_strided_slice %18 {offsets = [16, 0], sizes = [16, 256], strides = [1, 1]} : vector<32x256xf32> to vector<16x256xf32>
    %21 = arith.addf %19, %20 : vector<16x256xf32>
    %22 = arith.subf %19, %5 : vector<16x256xf32>
    %23 = math.absf %22 : vector<16x256xf32>
    %24 = arith.subf %21, %5 : vector<16x256xf32>
    %25 = math.absf %24 : vector<16x256xf32>
    %c1_i32 = arith.constant 1 : i32
    %26 = arith.muli %arg0, %c1_i32 : i32
    %27 = arith.addi %26, %arg1 : i32
    %c256_i32 = arith.constant 256 : i32
    %28 = arith.muli %27, %c256_i32 : i32
    %29 = tpu.iota {dimensions = array<i32: 1>} : vector<1x256xi32>
    %30 = vector.broadcast %28 : i32 to vector<1x256xi32>
    %31 = arith.addi %30, %29 : vector<1x256xi32>
    %c353_i32 = arith.constant 353 : i32
    %32 = vector.broadcast %c353_i32 : i32 to vector<1x256xi32>
    %33 = arith.cmpi slt, %31, %32 : vector<1x256xi32>
    %34 = arith.extui %33 : vector<1x256xi1> to vector<1x256xi32>
    %35 = arith.sitofp %34 : vector<1x256xi32> to vector<1x256xf32>
    %36 = vector.broadcast %35 : vector<1x256xf32> to vector<16x256xf32>
    %37 = arith.mulf %23, %36 : vector<16x256xf32>
    %38 = vector.broadcast %35 : vector<1x256xf32> to vector<16x256xf32>
    %39 = arith.mulf %25, %38 : vector<16x256xf32>
    %c0_14 = arith.constant 0 : index
    %c0_15 = arith.constant 0 : index
    %c0_16 = arith.constant 0 : index
    %40 = vector.load %arg8[%c0_14, %c0_15, %c0_16] : memref<1x16x256xf32, #tpu.memory_space<vmem>>, vector<1x16x256xf32>
    %41 = vector.shape_cast %37 : vector<16x256xf32> to vector<1x16x256xf32>
    %42 = arith.addf %40, %41 : vector<1x16x256xf32>
    %c0_17 = arith.constant 0 : index
    %c0_18 = arith.constant 0 : index
    %c0_19 = arith.constant 0 : index
    %43 = vector.load %arg8[%c0_17, %c0_18, %c0_19] : memref<1x16x256xf32, #tpu.memory_space<vmem>>, vector<1x16x256xf32>
    tpu.vector_store %arg8[%c0_17, %c0_18, %c0_19], %42 {strides = array<i32>} : memref<1x16x256xf32, #tpu.memory_space<vmem>>, vector<1x16x256xf32>,
    %c0_20 = arith.constant 0 : index
    %c0_21 = arith.constant 0 : index
    %c0_22 = arith.constant 0 : index
    %44 = vector.load %arg9[%c0_20, %c0_21, %c0_22] : memref<1x16x256xf32, #tpu.memory_space<vmem>>, vector<1x16x256xf32>
    %45 = vector.shape_cast %39 : vector<16x256xf32> to vector<1x16x256xf32>
    %46 = arith.addf %44, %45 : vector<1x16x256xf32>
    %c0_23 = arith.constant 0 : index
    %c0_24 = arith.constant 0 : index
    %c0_25 = arith.constant 0 : index
    %47 = vector.load %arg9[%c0_23, %c0_24, %c0_25] : memref<1x16x256xf32, #tpu.memory_space<vmem>>, vector<1x16x256xf32>
    tpu.vector_store %arg9[%c0_23, %c0_24, %c0_25], %46 {strides = array<i32>} : memref<1x16x256xf32, #tpu.memory_space<vmem>>, vector<1x16x256xf32>,
    return
  }
  func.func @transform_0(%arg0: i32, %arg1: i32) -> (i32, i32) {
    %c1_i32 = arith.constant 1 : i32
    %0 = arith.muli %arg0, %c1_i32 : i32
    %1 = arith.addi %0, %arg1 : i32
    %c0_i32 = arith.constant 0 : i32
    %c0_i32_0 = arith.constant 0 : i32
    return %c0_i32, %1 : i32, i32
  }
  func.func @transform_1(%arg0: i32, %arg1: i32) -> (i32, i32) {
    %c1_i32 = arith.constant 1 : i32
    %0 = arith.muli %arg0, %c1_i32 : i32
    %1 = arith.addi %0, %arg1 : i32
    %c0_i32 = arith.constant 0 : i32
    %c0_i32_0 = arith.constant 0 : i32
    return %c0_i32, %1 : i32, i32
  }
  func.func @transform_2(%arg0: i32, %arg1: i32) -> (i32, i32) {
    %c0_i32 = arith.constant 0 : i32
    %c0_i32_0 = arith.constant 0 : i32
    %c0_i32_1 = arith.constant 0 : i32
    return %c0_i32, %c0_i32_0 : i32, i32
  }
  func.func @transform_3(%arg0: i32, %arg1: i32) -> (i32, i32) {
    %c0_i32 = arith.constant 0 : i32
    %c0_i32_0 = arith.constant 0 : i32
    %c0_i32_1 = arith.constant 0 : i32
    return %c0_i32, %c0_i32_0 : i32, i32
  }
  func.func @transform_4(%arg0: i32, %arg1: i32) -> (i32, i32) {
    %c0_i32 = arith.constant 0 : i32
    %c0_i32_0 = arith.constant 0 : i32
    %c0_i32_1 = arith.constant 0 : i32
    return %c0_i32, %c0_i32_0 : i32, i32
  }
  func.func @transform_5(%arg0: i32, %arg1: i32) -> (i32, i32) {
    %c0_i32 = arith.constant 0 : i32
    %c0_i32_0 = arith.constant 0 : i32
    %c0_i32_1 = arith.constant 0 : i32
    return %c0_i32, %c0_i32_0 : i32, i32
  }
  func.func @transform_6(%arg0: i32, %arg1: i32) -> (i32, i32, i32) {
    %c0_i32 = arith.constant 0 : i32
    %c0_i32_0 = arith.constant 0 : i32
    %c0_i32_1 = arith.constant 0 : i32
    return %arg0, %c0_i32, %c0_i32_0 : i32, i32, i32
  }
  func.func @transform_7(%arg0: i32, %arg1: i32) -> (i32, i32, i32) {
    %c0_i32 = arith.constant 0 : i32
    %c0_i32_0 = arith.constant 0 : i32
    %c0_i32_1 = arith.constant 0 : i32
    return %arg0, %c0_i32, %c0_i32_0 : i32, i32, i32
  }
}

</mosaic_0001>

<bundles_post_ra>
// kernel: tpu_custom_call.1
= control target key start
LH: loop header
LB: loop body
LE: loop exit
PB: predicated region body
PF: predicated region fallthrough
CT: control target
= control target key end

     0   :  { %13 = vsyncpa [#allocation5], 0  ;;  %s1402_s0 = inlined_call_operand.vmem [shape: bf16[12,512], index: 0, kind: input, shape index: {}]   ;;  %s1403_s1 = inlined_call_operand.vmem [shape: bf16[16,512], index: 1, kind: input, shape index: {}]   ;;  %s1404_s2 = inlined_call_operand.vmem [shape: bf16[32,12], index: 2, kind: input, shape index: {}]   ;;  %s1405_s3 = inlined_call_operand.vmem [shape: f32[32,1], index: 3, kind: input, shape index: {}]   ;;  %s1406_s4 = inlined_call_operand.vmem [shape: bf16[32,32], index: 4, kind: input, shape index: {}]   ;;  %s1407_s5 = inlined_call_operand.vmem [shape: f32[32,1], index: 5, kind: input, shape index: {}]   ;;  %s1408_s6 = inlined_call_operand.hbm [shape: f32[2,16,256], index: 6, kind: output, shape index: {0}]   ;;  %s1409_s7 = inlined_call_operand.hbm [shape: f32[2,16,256], index: 7, kind: output, shape index: {1}]  }
   0x1   :  { %15 = vsyncpa [#allocation5 + $0x1], 0 }
   0x2   :  { %16 = vsyncpa [#allocation7], 0 }
   0x3   :  { %18 = vsyncpa [#allocation7 + $0x1], 0  ;;  %s1153_s24 = smov 0   ;;  %s1155_s25 = smov 0  }
   0x4   :  { %s1157_s26 = smov 0   ;;  %s1159_s27 = smov 0  }
   0x5   :  { %s1161_s28 = smov 0   ;;  %s1163_s29 = smov 0  }
   0x6 LB: > { %s881_s30 = sadd.s32 4294967295, %s1105_s29   ;;  %s882_s8 = sadd.s32 4294967294, %s1105_s29   ;;  %s1105_s29 = sphi %s1163_s29, %s24_s29   ;;  %s1101_s28 = sphi %s1161_s28, %s1419_s28   ;;  %s1097_s27 = sphi %s1159_s27, %s1418_s27   ;;  %s1093_s26 = sphi %s1157_s26, %s1417_s26   ;;  %s1089_s25 = sphi %s1155_s25, %s1416_s25   ;;  %s1085_s24 = sphi %s1153_s24, %s1415_s24  }
   0x7   : > { %s36_s9 = sadd.s32 1, %s1101_s28  ;;  %s45_s10 = sadd.s32 1, %s1093_s26 }
   0x8   : > { %p38_p0 = scmp.ge.s32.totalorder %s36_s9, 2  ;;  %p52_p1 = scmp.ne.s32.totalorder %s1093_s26, %s1089_s25 }
   0x9   : > { %p53_p2 = scmp.eq.s32.totalorder %s1105_s29, 0  ;;  %p194_p3 = scmp.eq.s32.totalorder %s881_s30, 1 }
   0xa   : > { %s1421_s9 = smov (%p38_p0, %s36_s9), 0  ;;  %p199_p6 = scmp.ne.s32.totalorder %s1089_s25, %s1085_s24 }
   0xb   : > { %p1192_p4 = por %p53_p2, %p52_p1  ;;  %p1196_p5 = por %p194_p3, %p52_p1 }
   0xc   : > { %s42_s13 = ssub.s32 %s1101_s28, %s1421_s9  ;;  %p200_p8 = scmp.eq.s32.totalorder %s882_s8, 1 }
   0xd   : > { %p43_p7 = scmp.eq.s32.totalorder %s42_s13, 0  ;;  %p884_p10 = scmp.ge.s32.totalorder %s1105_s29, 2 }
   0xe   : > { %p1207_p9 = por %p200_p8, %p199_p6 }
   0xf   : > { %s1205_s14 = scalar_select %p43_p7, %s1093_s26, %s45_s10  }
  0x10   : > { %254 = sbr.rel (%p884_p10) target bundleno = 37 (0x25), region = 32 }
  0x17   : > { %257 = sbr.rel (!%p1192_p4) target bundleno = 30 (0x1e), region = 36  ;;  %s259_s16 = sand.u32 (%p1192_p4), 1, %s1093_s26  }
  0x18   : > { %s918_s17 = sshll.u32 (%p1192_p4), %s1101_s28, 3  ;;  %s885_s18 = sshll.u32 (%p1192_p4), %s259_s16, 4 }
  0x19   : > { %s265_s21 = scalar_lea.vmem (%p1192_p4), %s1402_s0, %s918_s17  ;;  %s261_s22 = scalar_lea.vmem (%p1192_p4), [#allocation2], %s885_s18 }
  0x1a   : > { %v295_v0 = vld [vmem:[%s265_s21] sm:$0xff] (%p1192_p4)  ;;  %v297_v1 = vld [vmem:[%s265_s21 + $0x10] sm:$0xff] (%p1192_p4) }
  0x1b   : > { %296 = vst [vmem:[%s261_s22] sm:$0xff] (%p1192_p4), %v295_v0  ;;  %298 = vst [vmem:[%s261_s22 + $0x8] sm:$0xff] (%p1192_p4), %v297_v1 }
  0x1e PF: > { %304 = sbr.rel (!%p1192_p4) target bundleno = 37 (0x25), region = 74  ;;  %s306_s23 = sand.u32 (%p1192_p4), 1, %s1093_s26  }
  0x1f   : > { %s919_s30 = sshll.u32 (%p1192_p4), %s1101_s28, 3  ;;  %s888_s8 = sshll.u32 (%p1192_p4), %s306_s23, 4 }
  0x20   : > { %s312_s16 = scalar_lea.vmem (%p1192_p4), %s1403_s1, %s919_s30  ;;  %s308_s17 = scalar_lea.vmem (%p1192_p4), [#allocation3], %s888_s8 }
  0x21   : > { %v342_v2 = vld [vmem:[%s312_s16] sm:$0xff] (%p1192_p4)  ;;  %v344_v3 = vld [vmem:[%s312_s16 + $0x10] sm:$0xff] (%p1192_p4) }
  0x22   : > { %343 = vst [vmem:[%s308_s17] sm:$0xff] (%p1192_p4), %v342_v2  ;;  %345 = vst [vmem:[%s308_s17 + $0x8] sm:$0xff] (%p1192_p4), %v344_v3 }
  0x25 PF: > { %p891_p11 = scmp.ge.s32.totalorder %s1105_s29, 1  ;;  %p350_p12 = scmp.lt.s32.totalorder %s1105_s29, 3 }
  0x27   : > { %p351_p13 = pnand %p891_p11, %p350_p12 }
  0x28   : > { %s1231_s11 = sand.u32 (!%p351_p13), 1, %s1089_s25   ;;  %v1107_v4 = vmov (!%p351_p13), 0   ;;  %vm482_vm0 = vcmask (!%p351_p13), 1045504   ;;  %v433_v5 = vld [vmem:[%s1405_s3] sm:$0xff] (!%p351_p13)  ;;  %v435_v7 = vld [vmem:[%s1405_s3 + $0x10] sm:$0xff] (!%p351_p13)  ;;  %v434_v9 = vld [vmem:[%s1405_s3 + $0x8] sm:$0xff] (!%p351_p13)  ;;  %v674_v52 = vlaneseq (!%p351_p13) }
  0x29   : > { %354 = sbr.rel (%p351_p13) target bundleno = 547 (0x223), region = 112  ;;  %s892_s18 = sshll.u32 (!%p351_p13), %s1231_s11, 4  ;;  %521 = vmatprep.mubr.bf16.mxu0 (!%p351_p13), %v1107_v4  ;;  %986 = vset.pattern.permute.xlu0 (!%p351_p13), %v1107_v4  ;;  %v436_v10 = vld [vmem:[%s1405_s3 + $0x18] sm:$0xff] (!%p351_p13)  ;;  %v991_v12 = vld [vmem:[%s1404_s2] sm:$0xff] (!%p351_p13)   ;;  %vm475_vm1 = vcmask (!%p351_p13), 97280   ;;  %v559_v14 = vld [vmem:[%s1407_s5 + $0x8] sm:$0xff] (!%p351_p13) }
  0x2a   : > { %987 = vset.pattern.permute.xlu1 (!%p351_p13), %v1107_v4  ;;  %631 = vmatprep.mubr.bf16.mxu1 (!%p351_p13), %v1107_v4  ;;  %s359_s19 = scalar_lea.vmem (!%p351_p13), [#allocation2], %s892_s18  ;;  %v558_v13 = vld [vmem:[%s1407_s5] sm:$0xff] (!%p351_p13)  ;;  %v560_v15 = vld [vmem:[%s1407_s5 + $0x10] sm:$0xff] (!%p351_p13)  ;;  %v561_v16 = vld [vmem:[%s1407_s5 + $0x18] sm:$0xff] (!%p351_p13)  ;;  %vm592_vm2 = vcmask (!%p351_p13), 261120   ;;  %v675_v53 = vand.u32 (!%p351_p13), 127, %v674_v52 }
  0x2b   : > { %v988_v6 = vld [vmem:[%s359_s19 + $0x4] ss:$8 sps:$4 sm:$0x3f] (!%p351_p13)   ;;  %439 = vperm.xlu0 (!%p351_p13), %986, %v433_v5   ;;  %v990_v8 = vld [vmem:[%s359_s19] ss:$8 sps:$4 sm:$0x3f] (!%p351_p13)   ;;  %449 = vperm.xlu1 (!%p351_p13), %987, %v435_v7  }
  0x2c   : > { %900 = vmatprep.subr.msk.bf16.mxu0 (!%p351_p13), %vm482_vm0, %v988_v6  ;;  %v484_v11 = vsel (!%p351_p13), %vm482_vm0, %v990_v8, 0  ;;  %v992_v17 = vld [vmem:[%s1404_s2 + $0x8] sm:$0xff] (!%p351_p13)   ;;  %v993_v50 = vld [vmem:[%s1406_s4] sm:$0xff] (!%p351_p13)   ;;  %s907_s22 = sshll.u32 (!%p351_p13), %s1097_s27, 8  ;;  %v676_v55 = vadd.s32 (!%p351_p13), 128, %v675_v53  ;;  %s366_s23 = scalar_lea.vmem (!%p351_p13), [#allocation3], %s892_s18 }
  0x2d   : > { %490 = vmatpush1.bf16.msra.mxu0 (!%p351_p13), %v484_v11  ;;  %v994_v51 = vld [vmem:[%s1406_s4 + $0x8] sm:$0xff] (!%p351_p13)   ;;  %v677_v54 = vstv (!%p351_p13), %s907_s22  ;;  %v423_v56 = vld [vmem:[%s366_s23] sm:$0xff] (!%p351_p13)  ;;  %s894_s18 = sshll.u32 (!%p351_p13), %s1231_s11, 5  ;;  %s1410_s30 = sshll.u32 (!%p351_p13), %s1097_s27, 9 }
  0x2e   : > { %v678_v57 = vadd.s32 (!%p351_p13), %v677_v54, %v675_v53  ;;  %v679_v58 = vadd.s32 (!%p351_p13), %v677_v54, %v676_v55  ;;  %v1281_v59 = vld [vmem:[%s366_s23 + $0x8] sm:$0xff] (!%p351_p13)  ;;  %v425_v60 = vunpack.c.l.bf16 (!%p351_p13), %v423_v56  ;;  %v426_v63 = vunpack.c.h.bf16 (!%p351_p13), %v423_v56  ;;  %s396_s8 = scalar_lea.vmem (!%p351_p13), [#allocation4], %s894_s18  ;;  %s1304_s17 = scalar_lea.hbm (!%p351_p13), %s1408_s6, %s1410_s30 }
  0x2f   : > { %444 = vperm.xlu0 (!%p351_p13), %986, %v434_v9   ;;  %454 = vperm.xlu1 (!%p351_p13), %987, %v436_v10   ;;  %v427_v2 = vunpack.c.l.bf16 (!%p351_p13), %v1281_v59  ;;  %v428_v6 = vunpack.c.h.bf16 (!%p351_p13), %v1281_v59  ;;  %v1108_v10 = vmov (!%p351_p13), 0.0   ;;  %s737_s10 = sshll.u32 (!%p351_p13), %s396_s8, 4  ;;  %s719_s19 = scalar_lea.sflag (!%p351_p13), [#allocation5], %s1231_s11  ;;  %s1306_s10 = int_to_ptr.vmem [resolvable:$true] %s737_s10 }
  0x30   : > { %901 = vmatmul.mubr.msk.bf16.vlgmr.msra.gmra.mrb[0].mxu0 %vm475_vm1, %v991_v12  ;;  %vm680_vm3 = vcmp.lt.s32.totalorder %v678_v57, 353  ;;  %vm681_vm4 = vcmp.lt.s32.totalorder %v679_v58, 353  ;;  %s995_s20 = scalar_lea.vmem %s1306_s10, 512  ;;  %s1109_s21 = smov [#allocation4]  }
  0x31   : > { %531 = vmatprep.mubr.bf16.mxu0 %v1107_v4  ;;  %v1286_v11 = vsel %vm680_vm3, 1.0, %v1108_v10  ;;  %p996_p0 = scmp.ne.s32.totalorder %s1306_s10, %s995_s20  ;;  %s999_s22 = sshll.u32 %s1109_s21, 4  ;;  %s1000_s22 = int_to_ptr.vmem [resolvable:$false] %s999_s22 }
  0x32   : > { %s1001_s23 = scalar_lea.vmem %s1000_s22, 1024  ;;  %p1002_p3 = scmp.lt.s32.totalorder %s1306_s10, %s1000_s22 }
  0x33   : > { %564 = vperm.xlu0 %986, %v558_v13   ;;  %569 = vperm.xlu1 %987, %v559_v14   ;;  %p997_p1 = pnand %p996_p0, %p1196_p5  ;;  %p1003_p4 = scmp.lt.s32.totalorder %s1001_s23, %s995_s20 }
  0x35   : > { %p998_p2 = pneg %p997_p1  ;;  %p1004_p6 = por %p1003_p4, %p1002_p3 }
  0x37   : > { %574 = vperm.xlu0 %986, %v560_v15   ;;  %579 = vperm.xlu1 %987, %v561_v16   ;;  %v1288_v15 = vsel %vm681_vm4, 1.0, %v1108_v10  ;;  %p1005_p7 = pnand %p1004_p6, %p998_p2 }
  0x38   : > { %902 = vmatmul.mubr.msk.bf16.gmra.mrb[4].mxu0 %vm475_vm1, %v992_v17 }
  0xaa   : > { %v440_v18 = vpop.permute.xlu0 %439  ;;  %v450_v27 = vpop.permute.xlu1 %449 }
  0xae   : > { %v445_v22 = vpop.permute.xlu0 %444  ;;  %v455_v38 = vpop.permute.xlu1 %454 }
  0xb2   : > { %v565_v61 = vpop.permute.xlu0 %564  ;;  %v570_v3 = vpop.permute.xlu1 %569 }
 0x103   : > { %v523_v19 = vpop.f32.mrb[0].mxu0 }
 0x104   : > { %v524_v20 = vadd.f32 %v523_v19, %v440_v18  ;;  %v525_v21 = vpop.f32.mrb[1].mxu0 }
 0x105   : > { %v526_v23 = vadd.f32 %v525_v21, %v440_v18  ;;  %v527_v24 = vpop.f32.mrb[2].mxu0  ;;  %v575_v21 = vpop.permute.xlu0 %574 }
 0x106   : > { %v528_v25 = vadd.f32 %v527_v24, %v445_v22  ;;  %v529_v26 = vpop.f32.mrb[3].mxu0  ;;  %v542_v29 = vmax.f32 %v524_v20, 0.0 }
 0x107   : > { %v530_v28 = vadd.f32 %v529_v26, %v445_v22  ;;  %v543_v31 = vmax.f32 %v526_v23, 0.0 }
 0x108   : > { %v544_v30 = vmax.f32 %v528_v25, 0.0 }
 0x109   : > { %v545_v32 = vmax.f32 %v530_v28, 0.0  ;;  %v580_v28 = vpop.permute.xlu1 %579 }
 0x10a   : > { %v554_v33 = vpack.c.bf16 %v544_v30, %v542_v29 }
 0x10b   : > { %v533_v34 = vpop.f32.mrb[4].mxu0  ;;  %v555_v35 = vpack.c.bf16 %v545_v32, %v543_v31 }
 0x10c   : > { %v534_v36 = vadd.f32 %v533_v34, %v450_v27  ;;  %v535_v37 = vpop.f32.mrb[5].mxu0 }
 0x10d   : > { %v536_v39 = vadd.f32 %v535_v37, %v450_v27  ;;  %v537_v40 = vpop.f32.mrb[6].mxu0  ;;  %599 = vmatprep.subr.bf16.mxu1 %v555_v35 }
 0x10e   : > { %v538_v41 = vadd.f32 %v537_v40, %v455_v38  ;;  %v539_v42 = vpop.f32.mrb[7].mxu0  ;;  %600 = vmatpush1.bf16.msra.mxu1 %v554_v33  ;;  %v546_v44 = vmax.f32 %v534_v36, 0.0 }
 0x10f   : > { %v540_v43 = vadd.f32 %v539_v42, %v455_v38  ;;  %v547_v46 = vmax.f32 %v536_v39, 0.0 }
 0x110   : > { %v548_v45 = vmax.f32 %v538_v41, 0.0 }
 0x111   : > { %v549_v47 = vmax.f32 %v540_v43, 0.0 }
 0x112   : > { %v556_v48 = vpack.c.bf16 %v548_v45, %v546_v44 }
 0x113   : > { %v557_v49 = vpack.c.bf16 %v549_v47, %v547_v46 }
 0x115   : > { %601 = vmatprep.subr.bf16.mxu1 %v557_v49 }
 0x116   : > { %602 = vmatpush1.bf16.msra.mxu1 %v556_v48 }
 0x119   : > { %905 = vmatmul.mubr.msk.bf16.vlgmr.msra.gmra.mrb[0].mxu1 %vm592_vm2, %v993_v50 }
 0x11a   : > { %641 = vmatprep.mubr.bf16.mxu1 %v1107_v4 }
 0x121   : > { %906 = vmatmul.mubr.msk.bf16.gmra.mrb[4].mxu1 %vm592_vm2, %v994_v51 }
 0x1ec   : > { %v633_v62 = vpop.f32.mrb[0].mxu1 }
 0x1ed   : > { %v634_v0 = vadd.f32 %v633_v62, %v565_v61  ;;  %v635_v1 = vpop.f32.mrb[1].mxu1 }
 0x1ee   : > { %v636_v4 = vadd.f32 %v635_v1, %v565_v61  ;;  %v637_v5 = vpop.f32.mrb[2].mxu1 }
 0x1ef   : > { %v656_v7 = vsub.f32 %v634_v0, %v425_v60  ;;  %v638_v8 = vadd.f32 %v637_v5, %v570_v3  ;;  %v639_v9 = vpop.f32.mrb[3].mxu1 }
 0x1f0   : > { %v657_v12 = vsub.f32 %v636_v4, %v426_v63  ;;  %v640_v13 = vadd.f32 %v639_v9, %v570_v3 }
 0x1f1   : > { %v660_v14 = vand.u32 2147483647, %v656_v7  ;;  %v658_v16 = vsub.f32 %v638_v8, %v427_v2 }
 0x1f2   : > { %v661_v17 = vand.u32 2147483647, %v657_v12  ;;  %v659_v18 = vsub.f32 %v640_v13, %v428_v6 }
 0x1f3   : > { %v686_v19 = vmul.f32 %v1286_v11, %v660_v14  ;;  %v662_v20 = vand.u32 2147483647, %v658_v16 }
 0x1f4   : > { %v687_v22 = vmul.f32 %v1288_v15, %v661_v17  ;;  %v663_v23 = vand.u32 2147483647, %v659_v18  ;;  %v643_v24 = vpop.f32.mrb[4].mxu1 }
 0x1f5   : > { %v688_v25 = vmul.f32 %v1286_v11, %v662_v20  ;;  %v644_v26 = vadd.f32 %v643_v24, %v575_v21  ;;  %v645_v27 = vpop.f32.mrb[5].mxu1  ;;  %702 = vst [vmem:[%s396_s8] sm:$0xff] %v686_v19 }
 0x1f6   : > { %v689_v29 = vmul.f32 %v1288_v15, %v663_v23  ;;  %v646_v30 = vadd.f32 %v645_v27, %v575_v21  ;;  %v647_v31 = vpop.f32.mrb[6].mxu1  ;;  %703 = vst [vmem:[%s396_s8 + $0x8] sm:$0xff] %v687_v22 }
 0x1f7   : > { %v652_v32 = vadd.f32 %v644_v26, %v634_v0  ;;  %v648_v33 = vadd.f32 %v647_v31, %v580_v28  ;;  %v649_v34 = vpop.f32.mrb[7].mxu1  ;;  %704 = vst [vmem:[%s396_s8 + $0x10] sm:$0xff] %v688_v25 }
 0x1f8   : > { %v653_v35 = vadd.f32 %v646_v30, %v636_v4  ;;  %v650_v36 = vadd.f32 %v649_v34, %v580_v28  ;;  %705 = vst [vmem:[%s396_s8 + $0x18] sm:$0xff] %v689_v29 }
 0x1f9   : > { %v664_v37 = vsub.f32 %v652_v32, %v425_v60  ;;  %v654_v38 = vadd.f32 %v648_v33, %v638_v8 }
 0x1fa   : > { %v665_v39 = vsub.f32 %v653_v35, %v426_v63  ;;  %v655_v40 = vadd.f32 %v650_v36, %v640_v13 }
 0x1fb   : > { %v668_v41 = vand.u32 2147483647, %v664_v37  ;;  %v666_v42 = vsub.f32 %v654_v38, %v427_v2 }
 0x1fc   : > { %1008 = shalt.err (!%p1005_p7)
}
 0x1fd   : > { %s1009_s8 = scalar_lea.hbm %s1304_s17, 512  ;;  %s1013_s21 = scalar_lea.hbm %s1408_s6, 1024 }
 0x1fe   : > { %p1010_p8 = scmp.ne.s32.totalorder %s1304_s17, %s1009_s8  ;;  %p1014_p13 = scmp.lt.u32.totalorder %s1304_s17, %s1408_s6 }
 0x1ff   : > { %p1015_p0 = scmp.lt.u32.totalorder %s1013_s21, %s1009_s8  ;;  %p1017_p2 = scmp.lt.u32.totalorder %s1009_s8, %s1304_s17 }
 0x200   : > { %p1011_p11 = pnand %p1010_p8, %p1196_p5 }
 0x201   : > { %p1016_p1 = por %p1015_p0, %p1014_p13 }
 0x202   : > { %p1012_p12 = pneg %p1011_p11 }
 0x203   : > { %p1018_p3 = por %p1017_p2, %p1016_p1 }
 0x205   : > { %p1019_p4 = pnand %p1018_p3, %p1012_p12 }
 0x207   : > { %1022 = shalt.err (!%p1019_p4)
}
 0x208   : > { %s1110_s20 = smov 256   ;;  %s1111_s23 = smov 16   ;;  %v669_v43 = vand.u32 2147483647, %v665_v39  ;;  %v667_v44 = vsub.f32 %v655_v40, %v428_v6  ;;  %v690_v45 = vmul.f32 %v1286_v11, %v668_v41  ;;  %v670_v46 = vand.u32 2147483647, %v666_v42 }
 0x209   : > { %922 = dma.vmem_to_hbm [thread:$0]  (%p1196_p5), %s1306_s10, 512, %s1304_s17, %s719_s19, %s1110_s20, %s1110_s20, %s1111_s23  }
 0x20a   : > { %v691_v47 = vmul.f32 %v1288_v15, %v669_v43  ;;  %v671_v48 = vand.u32 2147483647, %v667_v44  ;;  %v692_v49 = vmul.f32 %v1286_v11, %v670_v46  ;;  %s403_s30 = scalar_lea.vmem [#allocation6], %s894_s18  ;;  %s1414_s10 = sshll.u32 %s1097_s27, 9 }
 0x20b   : > { %s753_s8 = sshll.u32 %s403_s30, 4  ;;  %714 = vst [vmem:[%s403_s30] sm:$0xff] %v690_v45  ;;  %s1348_s13 = scalar_lea.hbm %s1409_s7, %s1414_s10  ;;  %s1350_s8 = int_to_ptr.vmem [resolvable:$true] %s753_s8 }
 0x20c   : > { %v693_v50 = vmul.f32 %v1288_v15, %v671_v48  ;;  %715 = vst [vmem:[%s403_s30 + $0x8] sm:$0xff] %v691_v47  ;;  %716 = vst [vmem:[%s403_s30 + $0x10] sm:$0xff] %v692_v49  ;;  %s724_s16 = scalar_lea.sflag [#allocation7], %s1231_s11  ;;  %s1023_s18 = scalar_lea.vmem %s1350_s8, 512 }
 0x20d   : > { %p1024_p6 = scmp.ne.s32.totalorder %s1350_s8, %s1023_s18  ;;  %s1112_s21 = smov [#allocation6]  }
 0x20e   : > { %717 = vst [vmem:[%s403_s30 + $0x18] sm:$0xff] %v693_v50  ;;  %s1027_s27 = sshll.u32 %s1112_s21, 4  ;;  %s1028_s27 = int_to_ptr.vmem [resolvable:$false] %s1027_s27 }
 0x20f   : > { %p1025_p7 = pnand %p1024_p6, %p1196_p5  ;;  %s1029_s22 = scalar_lea.vmem %s1028_s27, 1024 }
 0x210   : > { %p1030_p11 = scmp.lt.s32.totalorder %s1350_s8, %s1028_s27  ;;  %p1031_p12 = scmp.lt.s32.totalorder %s1029_s22, %s1023_s18 }
 0x211   : > { %p1026_p8 = pneg %p1025_p7 }
 0x212   : > { %p1032_p13 = por %p1031_p12, %p1030_p11 }
 0x214   : > { %p1033_p0 = pnand %p1032_p13, %p1026_p8 }
 0x216   : > { %1036 = shalt.err (!%p1033_p0)
}
 0x217   : > { %s1037_s30 = scalar_lea.hbm %s1348_s13, 512  ;;  %s1041_s19 = scalar_lea.hbm %s1409_s7, 1024 }
 0x218   : > { %p1038_p1 = scmp.ne.s32.totalorder %s1348_s13, %s1037_s30  ;;  %p1042_p4 = scmp.lt.u32.totalorder %s1348_s13, %s1409_s7 }
 0x219   : > { %p1043_p6 = scmp.lt.u32.totalorder %s1041_s19, %s1037_s30  ;;  %p1045_p8 = scmp.lt.u32.totalorder %s1037_s30, %s1348_s13 }
 0x21a   : > { %p1039_p2 = pnand %p1038_p1, %p1196_p5 }
 0x21b   : > { %p1044_p7 = por %p1043_p6, %p1042_p4 }
 0x21c   : > { %p1040_p3 = pneg %p1039_p2 }
 0x21d   : > { %p1046_p11 = por %p1045_p8, %p1044_p7 }
 0x21f   : > { %p1047_p12 = pnand %p1046_p11, %p1040_p3 }
 0x221   : > { %1050 = shalt.err (!%p1047_p12)
}
 0x222   : > { %923 = dma.vmem_to_hbm [thread:$0]  (%p1196_p5), %s1350_s8, 512, %s1348_s13, %s724_s16, %s1110_s20, %s1110_s20, %s1111_s23  }
 0x223 PF: > { %s768_s18 = sand.u32 1, %s1085_s24   ;;  %p927_p13 = pnand %p884_p10, %p1207_p9 }
 0x224   : > { %s769_s22 = scalar_lea.sflag [#allocation5], %s768_s18 }
 0x225   : > { %1076 = dma.done.wait (!%p927_p13), %s769_s22, 512  }
 0x226   : > { %1078 = vsyncadd (!%p927_p13), %s769_s22, 4294966784  ;;  %s778_s12 = scalar_lea.sflag [#allocation7], %s768_s18 }
 0x227   : > { %1080 = dma.done.wait (!%p927_p13), %s778_s12, 512  }
 0x228   : > { %1082 = vsyncadd (!%p927_p13), %s778_s12, 4294966784  ;;  %s24_s29 = sadd.s32 1, %s1105_s29   ;;  %s1415_s24 = smov %s1089_s25 }
 0x229   : > { %p21_p0 = scmp.ge.s32.totalorder %s24_s29, 4   ;;  %s1416_s25 = smov %s1093_s26 }
 0x22a   : > { %s1417_s26 = smov %s1205_s14  ;;  %s1418_s27 = smov %s1101_s28 }
 0x22b   : > { %s1419_s28 = smov %s1421_s9  ;;  %23 = sbr.rel (!%p21_p0) target bundleno = 6 (0x6), region = 189 }
 0x232   :  { %783 = vsyncpa [#allocation5], 1 }
 0x233   :  { %785 = vsyncpa [#allocation5 + $0x1], 1 }
 0x234   :  { %786 = vsyncpa [#allocation7], 1 }
 0x235   :  { %788 = vsyncpa [#allocation7 + $0x1], 1 }

</bundles_post_ra>
